<compile_context>
chip_gen: v6e
topology: v6e:2x2x1
jax: 0.10.0
libtpu: 0.0.40
codegen_flags: <defaults>
</compile_context>

<pallas_src>
import functools

import jax
import jax.numpy as jnp
from jax.experimental import pallas as pl
from jax.experimental.pallas import tpu as pltpu

EPS = 1e-5
LANE = 128
SUBLANE_BF16 = 16


def _round_up(v, m):
    return (v + m - 1) // m * m


def _vmem_budget():
    """Per-generation VMEM budget: ~48 MiB on v7x, ~96 MiB on v5e/v6e."""
    cap = 64 * 1024 * 1024                      # conservative fallback (v7x)
    try:
        info = pltpu.get_tpu_info()
        cap = int(getattr(info, "vmem_capacity_bytes", cap))
    except Exception:
        pass
    return max(32 * 1024 * 1024, min(cap * 3 // 4, 100 * 1024 * 1024))


# ---------------------------------------------------------------------------
# Path 1: whole (16-padded) batch fits in one VMEM tile -> single fused kernel
# ---------------------------------------------------------------------------
def _fused_mlp_kernel(x_ref, w1_ref, g1_ref, be1_ref, w2_ref, g2_ref, be2_ref,
                      o_ref, *, n_valid, mask_rows):
    x = x_ref[...]                                            # (Np, Din) bf16
    h = jnp.dot(x, w1_ref[...], preferred_element_type=jnp.float32)     # f32
    inv_n = 1.0 / float(n_valid)

    # BN1 stats: pad rows of x are exactly 0 and the bias is dropped, so pad
    # rows of h are exactly 0 -> unmasked sums over Np rows are already exact.
    mu1 = jnp.sum(h, axis=0, keepdims=True) * inv_n
    var1 = jnp.maximum(jnp.sum(h * h, axis=0, keepdims=True) * inv_n
                       - mu1 * mu1, 0.0)
    scale1 = g1_ref[...] * jax.lax.rsqrt(var1 + EPS)          # (1, Hp) - EUP
    shift1 = be1_ref[...] - mu1 * scale1
    a = jnp.maximum(h * scale1 + shift1, 0.0)                 # fused FMA+ReLU

    if mask_rows:  # only needed when the batch was padded (trace-time flag)
        rows = jax.lax.broadcasted_iota(jnp.int32, (a.shape[0], 1), 0)
        a = a * (rows < n_valid).astype(jnp.float32)          # zero pad rows

    y = jnp.dot(a.astype(jnp.bfloat16), w2_ref[...],
                preferred_element_type=jnp.float32)

    # y pad rows are exactly 0 (a was masked) -> unmasked BN2 sums are exact.
    mu2 = jnp.sum(y, axis=0, keepdims=True) * inv_n
    var2 = jnp.maximum(jnp.sum(y * y, axis=0, keepdims=True) * inv_n
                       - mu2 * mu2, 0.0)
    scale2 = g2_ref[...] * jax.lax.rsqrt(var2 + EPS)
    shift2 = be2_ref[...] - mu2 * scale2
    o_ref[...] = jnp.maximum(y * scale2 + shift2, 0.0).astype(o_ref.dtype)


# ---------------------------------------------------------------------------
# Path 2: batch-tiled 3-pass pipeline (exact full-batch BN via partial sums)
# ---------------------------------------------------------------------------
def _lin1_stats_kernel(x_ref, w1_ref, h_ref, s1_ref, ss1_ref):
    h = jnp.dot(x_ref[...], w1_ref[...], preferred_element_type=jnp.float32)
    h_ref[...] = h.astype(h_ref.dtype)                        # bf16 store
    # Pad rows of x are exactly 0 -> h pad rows exactly 0 -> no row mask.
    s1_ref[...] = jnp.sum(h, axis=0, keepdims=True)[None]     # (1,1,Hp)
    ss1_ref[...] = jnp.sum(h * h, axis=0, keepdims=True)[None]


def _bn1_relu_lin2_stats_kernel(h_ref, sc1_ref, sh1_ref, w2_ref,
                                y_ref, s2_ref, ss2_ref, *, n_valid, mask_rows):
    h = h_ref[...].astype(jnp.float32)
    a = jnp.maximum(h * sc1_ref[...] + sh1_ref[...], 0.0)
    if mask_rows:
        i = pl.program_id(0)
        tm = a.shape[0]
        rows = jax.lax.broadcasted_iota(jnp.int32, (tm, 1), 0) + i * tm
        a = a * (rows < n_valid).astype(jnp.float32)          # one (tm,Hp) mul
    y = jnp.dot(a.astype(jnp.bfloat16), w2_ref[...],
                preferred_element_type=jnp.float32)
    y_ref[...] = y.astype(y_ref.dtype)                        # bf16 store
    # a was masked -> y pad rows exactly 0 -> unmasked partial sums are exact.
    s2_ref[...] = jnp.sum(y, axis=0, keepdims=True)[None]     # (1,1,Dp)
    ss2_ref[...] = jnp.sum(y * y, axis=0, keepdims=True)[None]


def _bn2_relu_kernel(y_ref, sc2_ref, sh2_ref, o_ref):
    y = y_ref[...].astype(jnp.float32)
    o_ref[...] = jnp.maximum(y * sc2_ref[...] + sh2_ref[...],
                             0.0).astype(o_ref.dtype)


# ---------------------------------------------------------------------------
# Parameter preparation (run once) and forward wrapper
# ---------------------------------------------------------------------------
def prepare_params(params):
    """Pad/cast weights once (hoisted out of the per-call forward)."""
    f32, bf16 = jnp.float32, jnp.bfloat16
    w1, b1, g1, be1, w2, b2, g2, be2 = params
    del b1, b2  # Linear bias is cancelled exactly by the train-mode BN.
    d_in, hidden = w1.shape
    d_out = w2.shape[1]
    hp = _round_up(hidden, LANE)
    dp = _round_up(d_out, LANE)
    w1p = jnp.zeros((d_in, hp), bf16).at[:, :hidden].set(w1.astype(bf16))
    w2p = jnp.zeros((hp, dp), bf16).at[:hidden, :d_out].set(w2.astype(bf16))
    g1p = jnp.zeros((1, hp), f32).at[:, :hidden].set(g1.reshape(1, -1).astype(f32))
    be1p = jnp.zeros((1, hp), f32).at[:, :hidden].set(be1.reshape(1, -1).astype(f32))
    g2p = jnp.zeros((1, dp), f32).at[:, :d_out].set(g2.reshape(1, -1).astype(f32))
    be2p = jnp.zeros((1, dp), f32).at[:, :d_out].set(be2.reshape(1, -1).astype(f32))
    return dict(w1=w1p, w2=w2p, g1=g1p, be1=be1p, g2=g2p, be2=be2p,
                d_in=d_in, hidden=hidden, d_out=d_out, hp=hp, dp=dp)


def mlp_forward(x, prep, *, tile_m=None, fuse_single_tile=True):
    """x: (N, ...) -> flattened to (N, input_size) like x.view(N, -1)."""
    f32, bf16 = jnp.float32, jnp.bfloat16
    n = x.shape[0]
    x2d = x.reshape(n, -1)
    d_in, d_out, hp, dp = prep["d_in"], prep["d_out"], prep["hp"], prep["dp"]
    assert x2d.shape[1] == d_in
    w1p, w2p = prep["w1"], prep["w2"]
    g1p, be1p, g2p, be2p = prep["g1"], prep["be1"], prep["g2"], prep["be2"]

    vmem_limit = _vmem_budget()
    n16 = _round_up(max(n, SUBLANE_BF16), SUBLANE_BF16)  # bf16 sublane packing

    # ---- Path 1: one fused kernel when the whole batch fits one VMEM tile --
    weight_bytes = w1p.size * 2 + w2p.size * 2
    per_row = 2 * d_in + 6 * hp + 8 * dp           # x + h(f32)+a(bf16) + y+out
    fused_rows_cap = min(4096, max(0, (vmem_limit // 2 - weight_bytes) // per_row))
    if fuse_single_tile and n16 <= fused_rows_cap:
        xp = jnp.zeros((n16, d_in), bf16).at[:n].set(x2d.astype(bf16))

        def full_spec(shape):
            return pl.BlockSpec(shape, lambda: (0,) * len(shape),
                                memory_space=pltpu.VMEM)

        args = (xp, w1p, g1p, be1p, w2p, g2p, be2p)
        out = pl.pallas_call(
            functools.partial(_fused_mlp_kernel, n_valid=n,
                              mask_rows=(n16 != n)),
            out_shape=jax.ShapeDtypeStruct((n16, dp), f32),
            in_specs=[full_spec(a.shape) for a in args],
            out_specs=full_spec((n16, dp)),
            compiler_params=pltpu.CompilerParams(vmem_limit_bytes=vmem_limit),
        )(*args)
        return out[:n, :d_out]

    # ---- Path 2: batch-tiled grid, exact BN via per-tile partial sums ------
    if tile_m is None:
        tile_m = 1024                               # multiple of 128; fits all gens
    tm = min(_round_up(tile_m, SUBLANE_BF16), n16)
    n_pad = _round_up(n, tm)
    n_tiles = n_pad // tm
    mask_rows = (n_pad != n)
    xp = jnp.zeros((n_pad, d_in), bf16).at[:n].set(x2d.astype(bf16))

    cparams = pltpu.CompilerParams(
        dimension_semantics=("parallel",),          # shard batch tiles (v7x 2 TCs)
        vmem_limit_bytes=vmem_limit)
    inv_n = 1.0 / float(n)

    # Pass A: h = x @ W1 (bf16 MXU), per-tile sum / sum-of-squares of h (f32),
    # h round-trips HBM in bf16.
    h, s1, ss1 = pl.pallas_call(
        _lin1_stats_kernel,
        grid=(n_tiles,),
        in_specs=[pl.BlockSpec((tm, d_in), lambda i: (i, 0)),
                  pl.BlockSpec((d_in, hp), lambda i: (0, 0))],
        out_specs=[pl.BlockSpec((tm, hp), lambda i: (i, 0)),
                   pl.BlockSpec((1, 1, hp), lambda i: (i, 0, 0)),
                   pl.BlockSpec((1, 1, hp), lambda i: (i, 0, 0))],
        out_shape=[jax.ShapeDtypeStruct((n_pad, hp), bf16),
                   jax.ShapeDtypeStruct((n_tiles, 1, hp), f32),
                   jax.ShapeDtypeStruct((n_tiles, 1, hp), f32)],
        compiler_params=cparams,
    )(xp, w1p)

    mu1 = jnp.sum(s1, axis=0) * inv_n                           # (1, hp)
    var1 = jnp.maximum(jnp.sum(ss1, axis=0) * inv_n - mu1 * mu1, 0.0)
    scale1 = g1p * jax.lax.rsqrt(var1 + EPS)
    shift1 = be1p - mu1 * scale1

    # Pass B: BN1 (fused FMA) + ReLU + Linear2, per-tile stats of y; y in bf16.
    y, s2, ss2 = pl.pallas_call(
        functools.partial(_bn1_relu_lin2_stats_kernel, n_valid=n,
                          mask_rows=mask_rows),
        grid=(n_tiles,),
        in_specs=[pl.BlockSpec((tm, hp), lambda i: (i, 0)),
                  pl.BlockSpec((1, hp), lambda i: (0, 0)),
                  pl.BlockSpec((1, hp), lambda i: (0, 0)),
                  pl.BlockSpec((hp, dp), lambda i: (0, 0))],
        out_specs=[pl.BlockSpec((tm, dp), lambda i: (i, 0)),
                   pl.BlockSpec((1, 1, dp), lambda i: (i, 0, 0)),
                   pl.BlockSpec((1, 1, dp), lambda i: (i, 0, 0))],
        out_shape=[jax.ShapeDtypeStruct((n_pad, dp), bf16),
                   jax.ShapeDtypeStruct((n_tiles, 1, dp), f32),
                   jax.ShapeDtypeStruct((n_tiles, 1, dp), f32)],
        compiler_params=cparams,
    )(h, scale1, shift1, w2p)

    mu2 = jnp.sum(s2, axis=0) * inv_n
    var2 = jnp.maximum(jnp.sum(ss2, axis=0) * inv_n - mu2 * mu2, 0.0)
    scale2 = g2p * jax.lax.rsqrt(var2 + EPS)
    shift2 = be2p - mu2 * scale2

    # Pass C: BN2 (fused FMA) + ReLU.
    out = pl.pallas_call(
        _bn2_relu_kernel,
        grid=(n_tiles,),
        in_specs=[pl.BlockSpec((tm, dp), lambda i: (i, 0)),
                  pl.BlockSpec((1, dp), lambda i: (0, 0)),
                  pl.BlockSpec((1, dp), lambda i: (0, 0))],
        out_specs=pl.BlockSpec((tm, dp), lambda i: (i, 0)),
        out_shape=jax.ShapeDtypeStruct((n_pad, dp), f32),
        compiler_params=cparams,
    )(y, scale2, shift2)

    return out[:n, :d_out]


# ---------------------------------------------------------------------------
# Reference (pure JAX, same PyTorch train-mode semantics, bf16 matmuls) + init
# ---------------------------------------------------------------------------
def _mlp_reference(x, params):
    w1, b1, g1, be1, w2, b2, g2, be2 = params
    x2d = x.reshape(x.shape[0], -1)

    def bn_relu(v, g, be):
        mu = jnp.mean(v, axis=0, keepdims=True)
        var = jnp.mean((v - mu) ** 2, axis=0, keepdims=True)    # biased var
        return jnp.maximum(
            g.reshape(1, -1) * (v - mu) * jax.lax.rsqrt(var + EPS)
            + be.reshape(1, -1), 0.0)

    h = jnp.dot(x2d.astype(jnp.bfloat16), w1.astype(jnp.bfloat16),
                preferred_element_type=jnp.float32) + b1.reshape(1, -1)
    a = bn_relu(h, g1, be1)
    y = jnp.dot(a.astype(jnp.bfloat16), w2.astype(jnp.bfloat16),
                preferred_element_type=jnp.float32) + b2.reshape(1, -1)
    return bn_relu(y, g2, be2)


def init_params(key, input_size, hidden_size, output_size):
    k1, k2, k3, k4 = jax.random.split(key, 4)
    w1 = (jax.random.normal(k1, (input_size, hidden_size), jnp.float32)
          * (1.0 / jnp.sqrt(input_size)))
    b1 = jax.random.normal(k2, (1, hidden_size), jnp.float32) * 0.01
    g1 = jnp.ones((1, hidden_size), jnp.float32)
    be1 = jnp.zeros((1, hidden_size), jnp.float32)
    w2 = (jax.random.normal(k3, (hidden_size, output_size), jnp.float32)
          * (1.0 / jnp.sqrt(hidden_size)))
    b2 = jax.random.normal(k4, (1, output_size), jnp.float32) * 0.01
    g2 = jnp.ones((1, output_size), jnp.float32)
    be2 = jnp.zeros((1, output_size), jnp.float32)
    return (w1, b1, g1, be1, w2, b2, g2, be2)


if __name__ == "__main__":
    # IMU-like shapes: 4 channels x 16 timesteps -> input_size 64.
    input_size, hidden_size, output_size = 64, 32, 16
    key = jax.random.PRNGKey(0)
    kx1, kx2, kp = jax.random.split(key, 3)
    params = init_params(kp, input_size, hidden_size, output_size)
    prep = prepare_params(params)          # pad/cast weights once (hoisted)

    # Path 1: small batch -> single fused kernel (the common case).
    x_small = jax.random.normal(kx1, (8, 4, 16), jnp.float32)
    out_small = mlp_forward(x_small, prep)
    jax.block_until_ready(out_small)
    assert out_small.shape == (8, output_size)
    assert bool(jnp.all(out_small >= 0.0))                     # final ReLU
    assert bool(jnp.allclose(out_small, _mlp_reference(x_small, params),
                             atol=5e-2, rtol=5e-2))

    # Path 2: batch-tiled 3-pass pipeline (ragged 40-row batch, 16-row tiles
    # exercises the grid, bf16 h/y round-trips, cross-tile BN stats, row mask).
    x_big = jax.random.normal(kx2, (40, 4, 16), jnp.float32)
    out_big = mlp_forward(x_big, prep, tile_m=16, fuse_single_tile=False)
    jax.block_until_ready(out_big)
    assert out_big.shape == (40, output_size)
    assert bool(jnp.all(out_big >= 0.0))
    assert bool(jnp.allclose(out_big, _mlp_reference(x_big, params),
                             atol=5e-2, rtol=5e-2))

    print("KERNEL_OK")
</pallas_src>

<mosaic_0001>
module attributes {stable_mosaic.version = 11 : i64} {
  func.func @_fused_mlp_kernel(%arg0: memref<16x64xbf16, #tpu.memory_space<vmem>>, %arg1: memref<64x128xbf16, #tpu.memory_space<vmem>>, %arg2: memref<1x128xf32, #tpu.memory_space<vmem>>, %arg3: memref<1x128xf32, #tpu.memory_space<vmem>>, %arg4: memref<128x128xbf16, #tpu.memory_space<vmem>>, %arg5: memref<1x128xf32, #tpu.memory_space<vmem>>, %arg6: memref<1x128xf32, #tpu.memory_space<vmem>>, %arg7: memref<16x128xf32, #tpu.memory_space<vmem>>) attributes {dimension_semantics = [], scalar_prefetch = 0 : i64, scratch_operands = 0 : i64, tpu.core_type = #tpu.core_type<tc>} {
    %c0 = arith.constant 0 : index
    %c0_0 = arith.constant 0 : index
    %0 = vector.load %arg0[%c0, %c0_0] : memref<16x64xbf16, #tpu.memory_space<vmem>>, vector<16x64xbf16>
    %c0_1 = arith.constant 0 : index
    %c0_2 = arith.constant 0 : index
    %1 = vector.load %arg1[%c0_1, %c0_2] : memref<64x128xbf16, #tpu.memory_space<vmem>>, vector<64x128xbf16>
    %cst = arith.constant dense<0.000000e+00> : vector<16x128xf32>
    %2 = tpu.matmul %0, %1, %cst {dimension_numbers = #tpu.dot_dimension_numbers<[1], [0], [0], [1], [0, 0, 1, 1], [], []>} : vector<16x64xbf16>, vector<64x128xbf16>, vector<16x128xf32> -> vector<16x128xf32>
    %cst_3 = arith.constant dense<0.000000e+00> : vector<128xf32>
    %3 = vector.multi_reduction <add>, %2, %cst_3 [0] : vector<16x128xf32> to vector<128xf32>
    %4 = vector.shape_cast %3 : vector<128xf32> to vector<1x128xf32>
    %cst_4 = arith.constant 1.250000e-01 : f32
    %5 = vector.broadcast %cst_4 : f32 to vector<1x128xf32>
    %6 = arith.mulf %4, %5 : vector<1x128xf32>
    %7 = arith.mulf %2, %2 : vector<16x128xf32>
    %cst_5 = arith.constant dense<0.000000e+00> : vector<128xf32>
    %8 = vector.multi_reduction <add>, %7, %cst_5 [0] : vector<16x128xf32> to vector<128xf32>
    %9 = vector.shape_cast %8 : vector<128xf32> to vector<1x128xf32>
    %cst_6 = arith.constant 1.250000e-01 : f32
    %10 = vector.broadcast %cst_6 : f32 to vector<1x128xf32>
    %11 = arith.mulf %9, %10 : vector<1x128xf32>
    %12 = arith.mulf %6, %6 : vector<1x128xf32>
    %13 = arith.subf %11, %12 : vector<1x128xf32>
    %cst_7 = arith.constant 0.000000e+00 : f32
    %14 = vector.broadcast %cst_7 : f32 to vector<1x128xf32>
    %15 = arith.maximumf %13, %14 : vector<1x128xf32>
    %c0_8 = arith.constant 0 : index
    %c0_9 = arith.constant 0 : index
    %16 = vector.load %arg2[%c0_8, %c0_9] : memref<1x128xf32, #tpu.memory_space<vmem>>, vector<1x128xf32>
    %cst_10 = arith.constant 9.99999974E-6 : f32
    %17 = vector.broadcast %cst_10 : f32 to vector<1x128xf32>
    %18 = arith.addf %15, %17 : vector<1x128xf32>
    %19 = math.rsqrt %18 : vector<1x128xf32>
    %20 = arith.mulf %16, %19 : vector<1x128xf32>
    %c0_11 = arith.constant 0 : index
    %c0_12 = arith.constant 0 : index
    %21 = vector.load %arg3[%c0_11, %c0_12] : memref<1x128xf32, #tpu.memory_space<vmem>>, vector<1x128xf32>
    %22 = arith.mulf %6, %20 : vector<1x128xf32>
    %23 = arith.subf %21, %22 : vector<1x128xf32>
    %24 = vector.broadcast %20 : vector<1x128xf32> to vector<16x128xf32>
    %25 = arith.mulf %2, %24 : vector<16x128xf32>
    %26 = vector.broadcast %23 : vector<1x128xf32> to vector<16x128xf32>
    %27 = arith.addf %25, %26 : vector<16x128xf32>
    %cst_13 = arith.constant 0.000000e+00 : f32
    %28 = vector.broadcast %cst_13 : f32 to vector<16x128xf32>
    %29 = arith.maximumf %27, %28 : vector<16x128xf32>
    %30 = tpu.iota {dimensions = array<i32: 0>} : vector<16x1xi32>
    %c8_i32 = arith.constant 8 : i32
    %31 = vector.broadcast %c8_i32 : i32 to vector<16x1xi32>
    %32 = arith.cmpi slt, %30, %31 : vector<16x1xi32>
    %33 = arith.extui %32 : vector<16x1xi1> to vector<16x1xi32>
    %34 = arith.sitofp %33 : vector<16x1xi32> to vector<16x1xf32>
    %35 = vector.broadcast %34 : vector<16x1xf32> to vector<16x128xf32>
    %36 = arith.mulf %29, %35 : vector<16x128xf32>
    %37 = arith.truncf %36 : vector<16x128xf32> to vector<16x128xbf16>
    %c0_14 = arith.constant 0 : index
    %c0_15 = arith.constant 0 : index
    %38 = vector.load %arg4[%c0_14, %c0_15] : memref<128x128xbf16, #tpu.memory_space<vmem>>, vector<128x128xbf16>
    %cst_16 = arith.constant dense<0.000000e+00> : vector<16x128xf32>
    %39 = tpu.matmul %37, %38, %cst_16 {dimension_numbers = #tpu.dot_dimension_numbers<[1], [0], [0], [1], [0, 0, 1, 1], [], []>} : vector<16x128xbf16>, vector<128x128xbf16>, vector<16x128xf32> -> vector<16x128xf32>
    %cst_17 = arith.constant dense<0.000000e+00> : vector<128xf32>
    %40 = vector.multi_reduction <add>, %39, %cst_17 [0] : vector<16x128xf32> to vector<128xf32>
    %41 = vector.shape_cast %40 : vector<128xf32> to vector<1x128xf32>
    %cst_18 = arith.constant 1.250000e-01 : f32
    %42 = vector.broadcast %cst_18 : f32 to vector<1x128xf32>
    %43 = arith.mulf %41, %42 : vector<1x128xf32>
    %44 = arith.mulf %39, %39 : vector<16x128xf32>
    %cst_19 = arith.constant dense<0.000000e+00> : vector<128xf32>
    %45 = vector.multi_reduction <add>, %44, %cst_19 [0] : vector<16x128xf32> to vector<128xf32>
    %46 = vector.shape_cast %45 : vector<128xf32> to vector<1x128xf32>
    %cst_20 = arith.constant 1.250000e-01 : f32
    %47 = vector.broadcast %cst_20 : f32 to vector<1x128xf32>
    %48 = arith.mulf %46, %47 : vector<1x128xf32>
    %49 = arith.mulf %43, %43 : vector<1x128xf32>
    %50 = arith.subf %48, %49 : vector<1x128xf32>
    %cst_21 = arith.constant 0.000000e+00 : f32
    %51 = vector.broadcast %cst_21 : f32 to vector<1x128xf32>
    %52 = arith.maximumf %50, %51 : vector<1x128xf32>
    %c0_22 = arith.constant 0 : index
    %c0_23 = arith.constant 0 : index
    %53 = vector.load %arg5[%c0_22, %c0_23] : memref<1x128xf32, #tpu.memory_space<vmem>>, vector<1x128xf32>
    %cst_24 = arith.constant 9.99999974E-6 : f32
    %54 = vector.broadcast %cst_24 : f32 to vector<1x128xf32>
    %55 = arith.addf %52, %54 : vector<1x128xf32>
    %56 = math.rsqrt %55 : vector<1x128xf32>
    %57 = arith.mulf %53, %56 : vector<1x128xf32>
    %c0_25 = arith.constant 0 : index
    %c0_26 = arith.constant 0 : index
    %58 = vector.load %arg6[%c0_25, %c0_26] : memref<1x128xf32, #tpu.memory_space<vmem>>, vector<1x128xf32>
    %59 = arith.mulf %43, %57 : vector<1x128xf32>
    %60 = arith.subf %58, %59 : vector<1x128xf32>
    %61 = vector.broadcast %57 : vector<1x128xf32> to vector<16x128xf32>
    %62 = arith.mulf %39, %61 : vector<16x128xf32>
    %63 = vector.broadcast %60 : vector<1x128xf32> to vector<16x128xf32>
    %64 = arith.addf %62, %63 : vector<16x128xf32>
    %cst_27 = arith.constant 0.000000e+00 : f32
    %65 = vector.broadcast %cst_27 : f32 to vector<16x128xf32>
    %66 = arith.maximumf %64, %65 : vector<16x128xf32>
    %c0_28 = arith.constant 0 : index
    %c0_29 = arith.constant 0 : index
    %67 = vector.load %arg7[%c0_28, %c0_29] : memref<16x128xf32, #tpu.memory_space<vmem>>, vector<16x128xf32>
    tpu.vector_store %arg7[%c0_28, %c0_29], %66 {strides = array<i32>} : memref<16x128xf32, #tpu.memory_space<vmem>>, vector<16x128xf32>,
    return
  }
}

</mosaic_0001>

<bundles_post_ra>
// kernel: tpu_custom_call.1
= control target key start
LH: loop header
LB: loop body
LE: loop exit
PB: predicated region body
PF: predicated region fallthrough
CT: control target
= control target key end

     0   :  { %12 = vsyncpa [#allocation3], 0  ;;  %s629_s0 = inlined_call_operand.hbm [shape: bf16[16,64], index: 0, kind: input, shape index: {}]   ;;  %s630_s1 = inlined_call_operand.hbm [shape: bf16[64,128], index: 1, kind: input, shape index: {}]   ;;  %s631_s2 = inlined_call_operand.vmem [shape: f32[1,128], index: 2, kind: input, shape index: {}]   ;;  %s632_s3 = inlined_call_operand.vmem [shape: f32[1,128], index: 3, kind: input, shape index: {}]   ;;  %s633_s4 = inlined_call_operand.hbm [shape: bf16[128,128], index: 4, kind: input, shape index: {}]   ;;  %s634_s5 = inlined_call_operand.vmem [shape: f32[1,128], index: 5, kind: input, shape index: {}]   ;;  %s635_s6 = inlined_call_operand.vmem [shape: f32[1,128], index: 6, kind: input, shape index: {}]   ;;  %s636_s7 = inlined_call_operand.hbm [shape: f32[16,128], index: 7, kind: output, shape index: {}]  }
   0x1   :  { %13 = vsyncpa [#allocation6], 0 }
   0x2   :  { %14 = vsyncpa [#allocation4], 0  ;;  %s555_s24 = smov [#allocation5]   ;;  %s556_s26 = smov [#allocation2]  }
   0x3   :  { %s32_s25 = sshll.u32 %s555_s24, 4  ;;  %s20_s27 = sshll.u32 %s556_s26, 4  ;;  %s33_s25 = int_to_ptr.vmem [resolvable:$true] %s32_s25  ;;  %s21_s27 = int_to_ptr.vmem [resolvable:$true] %s20_s27 }
   0x4   :  { %s477_s28 = scalar_lea.vmem %s33_s25, 512  ;;  %p482_p1 = scmp.lt.s32.totalorder %s33_s25, %s33_s25 }
   0x5   :  { %p478_p0 = scmp.ne.s32.totalorder %s33_s25, %s477_s28  ;;  %p483_p2 = scmp.lt.s32.totalorder %s477_s28, %s477_s28 }
   0x7   :  { %p484_p3 = por %p483_p2, %p482_p1 }
   0x9   :  { %p485_p4 = pnand %p484_p3, %p478_p0 }
   0xb   :  { %488 = shalt.err (!%p485_p4)
}
   0xc   :  { %s557_s29 = smov 64   ;;  %s558_s30 = smov 4  }
   0xd   :  { %38 = dma.hbm_to_vmem [thread:$0]  %s630_s1, 512, %s33_s25, [#allocation6], %s557_s29, %s557_s29, %s558_s30  }
   0xe   :  { %s497_s10 = scalar_lea.vmem %s21_s27, 128  ;;  %p502_p6 = scmp.lt.s32.totalorder %s21_s27, %s21_s27 }
   0xf   :  { %p498_p5 = scmp.ne.s32.totalorder %s21_s27, %s497_s10  ;;  %p503_p7 = scmp.lt.s32.totalorder %s497_s10, %s497_s10 }
  0x11   :  { %p504_p8 = por %p503_p7, %p502_p6 }
  0x13   :  { %p505_p9 = pnand %p504_p8, %p498_p5 }
  0x15   :  { %508 = shalt.err (!%p505_p9)
}
  0x16   :  { %26 = dma.hbm_to_vmem [thread:$0]  %s629_s0, 128, %s21_s27, [#allocation3], %s557_s29, %s557_s29, %s558_s30  }
  0x17   :  { %s559_s13 = smov [#allocation7]  }
  0x18   :  { %s48_s14 = sshll.u32 %s559_s13, 4  ;;  %s49_s14 = int_to_ptr.vmem [resolvable:$true] %s48_s14 }
  0x19   :  { %s517_s15 = scalar_lea.vmem %s49_s14, 1024  ;;  %p522_p11 = scmp.lt.s32.totalorder %s49_s14, %s49_s14 }
  0x1a   :  { %p518_p10 = scmp.ne.s32.totalorder %s49_s14, %s517_s15  ;;  %p523_p12 = scmp.lt.s32.totalorder %s517_s15, %s517_s15 }
  0x1c   :  { %p524_p13 = por %p523_p12, %p522_p11 }
  0x1e   :  { %p525_p0 = pnand %p524_p13, %p518_p10 }
  0x20   :  { %528 = shalt.err (!%p525_p0)
}
  0x21   :  { %54 = dma.hbm_to_vmem [thread:$0]  %s633_s4, 1024, %s49_s14, [#allocation6], %s557_s29, %s557_s29, %s558_s30  }
  0x22   :  { %549 = dma.done.wait [#allocation3], 128  }
  0x23   :  { %550 = vsyncadd [#allocation3], 4294967168 }
  0x24   :  { %551 = dma.done.wait [#allocation6], 1536  }
  0x25   :  { %552 = vsyncadd [#allocation6], 4294965760  ;;  %v560_v0 = vmov 0.0   ;;  %vm561_vm0 = vmmov 0   ;;  %v452_v1 = vld [vmem:[#allocation5 + $0x18] sm:$0xff]   ;;  %v453_v2 = vld [vmem:[#allocation5 + $0x10] sm:$0xff]   ;;  %v182_v40 = vlaneseq }
  0x26   :  { %410 = vmatprep.subr.bf16.mxu0 %v560_v0  ;;  %418 = vmatprep.mubr.msk.bf16.mxu0 %vm561_vm0, %v560_v0  ;;  %v454_v3 = vld [vmem:[#allocation5 + $0x8] sm:$0xff]   ;;  %v455_v4 = vld [vmem:[#allocation5] sm:$0xff]   ;;  %v456_v5 = vld [vmem:[#allocation2] sm:$0xff]   ;;  %vm108_vm1 = vcmask 523264   ;;  %s562_s21 = smov [#allocation8]  }
  0x27   :  { %422 = vmatprep.subr.bf16.mxu1 %v560_v0  ;;  %438 = vmatprep.mubr.msk.bf16.mxu1 %vm561_vm0, %v560_v0  ;;  %v457_v6 = vld [vmem:[#allocation7 + $0x38] sm:$0xff]   ;;  %v458_v7 = vld [vmem:[#allocation7 + $0x30] sm:$0xff]   ;;  %v459_v8 = vld [vmem:[#allocation7 + $0x28] sm:$0xff]   ;;  %v183_v41 = vshrl.u32 %v182_v40, 7  ;;  %s369_s22 = sshll.u32 %s562_s21, 4  ;;  %s370_s22 = int_to_ptr.vmem [resolvable:$true] %s369_s22 }
  0x28   :  { %411 = vmatpush3.bf16.msra.mxu0 %v452_v1  ;;  %423 = vmatpush3.bf16.msra.mxu1 %v457_v6  ;;  %v460_v9 = vld [vmem:[#allocation7 + $0x20] sm:$0xff]   ;;  %v461_v10 = vld [vmem:[#allocation7 + $0x18] sm:$0xff]   ;;  %v462_v11 = vld [vmem:[#allocation7 + $0x10] sm:$0xff]   ;;  %p534_p2 = scmp.lt.s32.totalorder %s370_s22, %s370_s22 }
  0x29   :  { %412 = vmatprep.subr.bf16.mxu0 %v560_v0  ;;  %424 = vmatprep.subr.bf16.mxu1 %v560_v0  ;;  %v463_v12 = vld [vmem:[#allocation7 + $0x8] sm:$0xff]   ;;  %v464_v13 = vld [vmem:[#allocation7] sm:$0xff]   ;;  %v174_v42 = vld [vmem:[%s631_s2] sm:$0x1]  ;;  %v184_v43 = vsub.s32 0, %v183_v41 }
  0x2a   :  { %v178_v46 = vld [vmem:[%s632_s3] sm:$0x1] }
  0x2c   :  { %413 = vmatpush3.bf16.msra.mxu0 %v453_v2  ;;  %425 = vmatpush3.bf16.msra.mxu1 %v458_v7 }
  0x2d   :  { %414 = vmatprep.subr.bf16.mxu0 %v560_v0  ;;  %426 = vmatprep.subr.bf16.mxu1 %v560_v0 }
  0x30   :  { %415 = vmatpush3.bf16.msra.mxu0 %v454_v3  ;;  %427 = vmatpush3.bf16.msra.mxu1 %v459_v8 }
  0x31   :  { %416 = vmatprep.subr.bf16.mxu0 %v560_v0  ;;  %428 = vmatprep.subr.bf16.mxu1 %v560_v0 }
  0x34   :  { %417 = vmatpush3.bf16.msra.mxu0 %v455_v4  ;;  %429 = vmatpush3.bf16.msra.mxu1 %v460_v9 }
  0x35   :  { %430 = vmatprep.subr.bf16.mxu1 %v560_v0 }
  0x37   :  { %419 = vmatmul.mubr.msk.bf16.vlgmr.msra.gmra.mxu0 %vm108_vm1, %v456_v5 }
  0x38   :  { %431 = vmatpush3.bf16.msra.mxu1 %v461_v10 }
  0x39   :  { %432 = vmatprep.subr.bf16.mxu1 %v560_v0 }
  0x3c   :  { %433 = vmatpush3.bf16.msra.mxu1 %v462_v11 }
  0x3d   :  { %434 = vmatprep.subr.bf16.mxu1 %v560_v0 }
  0x40   :  { %435 = vmatpush3.bf16.msra.mxu1 %v463_v12 }
  0x41   :  { %436 = vmatprep.subr.bf16.mxu1 %v560_v0 }
  0x44   :  { %437 = vmatpush3.bf16.msra.mxu1 %v464_v13 }
  0xf7   :  { %v146_v14 = vpop.f32.mrf.mxu0 }
  0xf8   :  { %v161_v17 = vmul.f32 %v146_v14, %v146_v14 }
  0xf9   :  { %v420_v15 = vpop.f32.mrf.mxu0 }
  0xfb   :  { %v149_v16 = vpop.f32.mrf.mxu0 }
  0xfc   :  { %v153_v18 = vadd.f32 %v149_v16, %v146_v14  ;;  %v162_v19 = vmul.f32 %v149_v16, %v149_v16 }
  0xfd   :  { %v421_v20 = vpop.f32.mrf.mxu0 }
  0xfe   :  { %v154_v21 = vrot.slane %v153_v18, 4  ;;  %v163_v22 = vadd.f32 %v162_v19, %v161_v17 }
 0x100   :  { %v155_v23 = vadd.f32 %v154_v21, %v153_v18  ;;  %v164_v24 = vrot.slane %v163_v22, 4  ;;  %v337_v21 = vld [vmem:[%s634_s5] sm:$0x1]  ;;  %s529_s5 = scalar_lea.vmem %s370_s22, 256 }
 0x101   :  { %p530_p1 = scmp.ne.s32.totalorder %s370_s22, %s529_s5  ;;  %p535_p3 = scmp.lt.s32.totalorder %s529_s5, %s529_s5 }
 0x102   :  { %v156_v25 = vrot.slane %v155_v23, 2  ;;  %v165_v26 = vadd.f32 %v164_v24, %v163_v22  ;;  %v341_v24 = vld [vmem:[%s635_s6] sm:$0x1] }
 0x103   :  { %p536_p4 = por %p535_p3, %p534_p2 }
 0x104   :  { %v157_v27 = vadd.f32 %v156_v25, %v155_v23  ;;  %v166_v28 = vrot.slane %v165_v26, 2 }
 0x105   :  { %p537_p5 = pnand %p536_p4, %p530_p1 }
 0x106   :  { %v158_v29 = vrot.slane %v157_v27, 1  ;;  %v167_v30 = vadd.f32 %v166_v28, %v165_v26 }
 0x108   :  { %v159_v31 = vadd.f32 %v158_v29, %v157_v27  ;;  %v168_v32 = vrot.slane %v167_v30, 1 }
 0x10a   :  { %v160_v33 = vmul.f32 0.125, %v159_v31  ;;  %v169_v34 = vadd.f32 %v168_v32, %v167_v30 }
 0x10c   :  { %v170_v35 = vmul.f32 0.125, %v169_v34  ;;  %v171_v36 = vmul.f32 %v160_v33, %v160_v33 }
 0x10e   :  { %v172_v37 = vsub.f32 %v170_v35, %v171_v36 }
 0x110   :  { %v173_v38 = vmax.f32 %v172_v37, 0.0 }
 0x112   :  { %v175_v39 = vadd.f32 1e-05, %v173_v38 }
 0x114   :  { %465 = vrsqrt.f32 %v175_v39 }
 0x121   :  { %v466_v44 = vpop.eup %465 }
 0x122   :  { %v177_v45 = vmul.f32 %v466_v44, %v174_v42 }
 0x124   :  { %v179_v47 = vmul.f32 %v177_v45, %v160_v33  ;;  %v185_v48 = vrot.slane %v177_v45, %v184_v43 }
 0x126   :  { %v180_v49 = vsub.f32 %v178_v46, %v179_v47  ;;  %v187_v50 = vmul.f32 %v185_v48, %v146_v14  ;;  %v188_v51 = vmul.f32 %v185_v48, %v149_v16 }
 0x128   :  { %v193_v52 = vrot.slane %v180_v49, %v184_v43 }
 0x12a   :  { %v196_v53 = vadd.f32 %v193_v52, %v188_v51  ;;  %v195_v54 = vadd.f32 %v193_v52, %v187_v50 }
 0x12c   :  { %v198_v55 = vmax.f32 %v196_v53, 0.0  ;;  %v197_v56 = vmax.f32 %v195_v54, 0.0 }
 0x12e   :  { %v209_v57 = vmul.f32 0.0, %v198_v55 }
 0x130   :  { %v210_v58 = vpack.c.bf16 %v209_v57, %v197_v56 }
 0x132   :  { %439 = vmatmul.mubr.bf16.vlgmr.msra.gmra.mxu1 %v210_v58 }
 0x1f2   :  { %v309_v59 = vpop.f32.mrf.mxu1 }
 0x1f3   :  { %v324_v62 = vmul.f32 %v309_v59, %v309_v59 }
 0x1f4   :  { %v440_v60 = vpop.f32.mrf.mxu1 }
 0x1f6   :  { %v312_v61 = vpop.f32.mrf.mxu1 }
 0x1f7   :  { %v316_v63 = vadd.f32 %v312_v61, %v309_v59  ;;  %v325_v0 = vmul.f32 %v312_v61, %v312_v61 }
 0x1f8   :  { %v441_v1 = vpop.f32.mrf.mxu1 }
 0x1f9   :  { %v317_v2 = vrot.slane %v316_v63, 4  ;;  %v326_v3 = vadd.f32 %v325_v0, %v324_v62 }
 0x1fb   :  { %v318_v4 = vadd.f32 %v317_v2, %v316_v63  ;;  %v327_v5 = vrot.slane %v326_v3, 4 }
 0x1fd   :  { %v319_v6 = vrot.slane %v318_v4, 2  ;;  %v328_v7 = vadd.f32 %v327_v5, %v326_v3 }
 0x1ff   :  { %v320_v8 = vadd.f32 %v319_v6, %v318_v4  ;;  %v329_v9 = vrot.slane %v328_v7, 2 }
 0x201   :  { %v321_v10 = vrot.slane %v320_v8, 1  ;;  %v330_v11 = vadd.f32 %v329_v9, %v328_v7 }
 0x203   :  { %v322_v12 = vadd.f32 %v321_v10, %v320_v8  ;;  %v331_v13 = vrot.slane %v330_v11, 1 }
 0x205   :  { %v323_v14 = vmul.f32 0.125, %v322_v12  ;;  %v332_v15 = vadd.f32 %v331_v13, %v330_v11 }
 0x207   :  { %v333_v16 = vmul.f32 0.125, %v332_v15  ;;  %v334_v17 = vmul.f32 %v323_v14, %v323_v14 }
 0x209   :  { %v335_v18 = vsub.f32 %v333_v16, %v334_v17 }
 0x20b   :  { %v336_v19 = vmax.f32 %v335_v18, 0.0 }
 0x20d   :  { %v338_v20 = vadd.f32 1e-05, %v336_v19 }
 0x20f   :  { %467 = vrsqrt.f32 %v338_v20 }
 0x21c   :  { %v468_v22 = vpop.eup %467 }
 0x21d   :  { %v340_v23 = vmul.f32 %v468_v22, %v337_v21 }
 0x21f   :  { %v342_v25 = vmul.f32 %v340_v23, %v323_v14  ;;  %v348_v26 = vrot.slane %v340_v23, %v184_v43 }
 0x221   :  { %v343_v27 = vsub.f32 %v341_v24, %v342_v25  ;;  %v350_v28 = vmul.f32 %v348_v26, %v309_v59  ;;  %v351_v29 = vmul.f32 %v348_v26, %v312_v61 }
 0x223   :  { %v356_v30 = vrot.slane %v343_v27, %v184_v43 }
 0x225   :  { %v358_v31 = vadd.f32 %v356_v30, %v350_v28  ;;  %v359_v32 = vadd.f32 %v356_v30, %v351_v29 }
 0x227   :  { %v360_v33 = vmax.f32 %v358_v31, 0.0  ;;  %v361_v34 = vmax.f32 %v359_v32, 0.0 }
 0x229   :  { %363 = vst [vmem:[#allocation8 + $0x8] sm:$0xff] %v361_v34  ;;  %362 = vst [vmem:[#allocation8] sm:$0xff] %v360_v33 }
 0x22a   :  { %540 = shalt.err (!%p537_p5)
}
 0x22b   :  { %s563_s6 = smov 128   ;;  %s564_s23 = smov 8  }
 0x22c   :  { %375 = dma.vmem_to_hbm [thread:$0]  %s370_s22, 256, %s636_s7, [#allocation4], %s563_s6, %s563_s6, %s564_s23  }
 0x22d   :  { %553 = dma.done.wait [#allocation4], 256  }
 0x22e   :  { %554 = vsyncadd [#allocation4], 4294967040 }
 0x22f   :  { %379 = vsyncpa [#allocation3], 1 }
 0x230   :  { %380 = vsyncpa [#allocation6], 1 }
 0x231   :  { %381 = vsyncpa [#allocation4], 1 }

</bundles_post_ra>
